<compile_context>
chip_gen: v7x
topology: tpu7x:2x2x1
jax: 0.10.0
libtpu: 0.0.40
codegen_flags: <defaults>
</compile_context>

<pallas_src>
import jax
import jax.numpy as jnp
from jax.experimental import pallas as pl
from jax.experimental.pallas import tpu as pltpu

EPS = 1e-5  # nn.InstanceNorm2d default


def _make_kernel(H, W):
    HW = H * W

    def kernel(coord_ref, x_ref, w_ref, o_ref):
        x = x_ref[...].astype(jnp.float32)                 # (BC, HW) — also the residual
        bc = x.shape[0]

        # Precomputed lane coordinates: row 0 = x (column), row 1 = y (row).
        coords = coord_ref[...]                            # (2, HW) int32
        col = jnp.broadcast_to(coords[0:1, :], (bc, HW))
        row = jnp.broadcast_to(coords[1:2, :], (bc, HW))
        at_x0 = col == 0
        at_xW1 = col == (W - 1)
        at_y0 = row == 0
        at_yH1 = row == (H - 1)

        def lroll(a, elems):
            # result[., p] = a[., (p + elems) % HW]   (pure lane rotation, XLU slot)
            return pltpu.roll(a, (-elems) % HW, axis=1)

        # --- reflection-correct column (dx) shifts ---------------------------
        x_next = lroll(x, 1)     # X[., x+1]  (wrong at x=W-1, fixed by mask)
        x_prev = lroll(x, -1)    # X[., x-1]  (wrong at x=0,  fixed by mask)
        col_shift = [
            jnp.where(at_x0, x_next, x_prev),    # dx=-1 : reflect x=-1 -> x=1
            x,                                   # dx= 0
            jnp.where(at_xW1, x_prev, x_next),   # dx=+1 : reflect x=W -> x=W-2
        ]

        # --- 9 reflect-shifted images, tap index t = kx*3 + ky ----------------
        taps = []
        for kx in range(3):
            a = col_shift[kx]
            a_down = lroll(a, W)      # row y+1 (wrong at y=H-1, masked below)
            a_up = lroll(a, -W)       # row y-1 (wrong at y=0,  masked below)
            taps.append(jnp.where(at_y0, a_down, a_up))    # dy=-1 : reflect y=-1 -> 1
            taps.append(a)                                 # dy= 0
            taps.append(jnp.where(at_yH1, a_up, a_down))   # dy=+1 : reflect y=H -> H-2
        stacked = jnp.concatenate(taps, axis=0)             # (9*BC, HW)

        # --- whole 3x3 conv (entire batch tile) = ONE MXU contraction ---------
        acc = jnp.dot(w_ref[...], stacked,
                      preferred_element_type=jnp.float32,
                      precision=jax.lax.Precision.HIGHEST)   # (BC, HW)

        # Conv bias omitted: a per-channel constant cancels exactly under the
        # mean subtraction of affine-free InstanceNorm (semantics unchanged).

        # --- InstanceNorm2d (affine=False): per row (sample,channel) over HW --
        inv_hw = 1.0 / float(HW)
        mean = jnp.sum(acc, axis=1, keepdims=True) * inv_hw
        cent = acc - mean
        var = jnp.sum(cent * cent, axis=1, keepdims=True) * inv_hw
        normed = cent * jax.lax.rsqrt(var + EPS)             # EUP rsqrt

        # --- residual add ------------------------------------------------------
        o_ref[...] = (x + normed).astype(o_ref.dtype)

    return kernel


def resnet_block(x_nchw, w_oihw, b=None, *, max_imgs_per_step=8):
    """out = x + InstanceNorm(Conv3x3(ReflectPad1(x))).   x_nchw: (N,C,H,W).

    `b` (the Conv2d bias) is accepted for API fidelity but unused: it is
    mathematically cancelled by the affine-free InstanceNorm.
    """
    del b
    N, C, H, W = x_nchw.shape
    HW = H * W

    # Batch tile: fold as many images as possible onto sublanes so the grid is
    # a single step for small batches (grid steps are serial on v5e/v6e); for
    # big batches the 'parallel' grid lets v7x's two TCs split the work.
    bt = min(N, max_imgs_per_step)
    while N % bt:
        bt -= 1
    bc = bt * C

    # Free, contiguous reshape (no transpose): channels/batch on sublanes,
    # spatial on lanes (HW = 256 -> unmasked 128-lane stores).
    x_flat = x_nchw.reshape(N * C, HW)

    # Weights (O,I,kh,kw) -> per-tap (t = kx*3 + ky, O, I), then block-diagonal
    # over the batch tile so a single (bc, 9*bc) x (9*bc, HW) dot performs the
    # whole convolution without mixing channels across samples.
    w_taps = jnp.transpose(w_oihw, (3, 2, 0, 1)).reshape(9, C, C).astype(jnp.float32)
    eye_b = jnp.eye(bt, dtype=jnp.float32)
    blk = jnp.einsum('bd,toi->tbodi', eye_b, w_taps).reshape(9, bc, bc)
    w_big = jnp.transpose(blk, (1, 0, 2)).reshape(bc, 9 * bc)

    # Lane coordinate map (x, y) — no in-kernel iota / integer modulo, and
    # correct for non-power-of-two W as well.
    lanes = jnp.arange(HW, dtype=jnp.int32)
    coords = jnp.stack([lanes % W, lanes // W], axis=0)      # (2, HW) int32

    out_flat = pl.pallas_call(
        _make_kernel(H, W),
        out_shape=jax.ShapeDtypeStruct((N * C, HW), x_nchw.dtype),
        grid_spec=pltpu.PrefetchScalarGridSpec(
            num_scalar_prefetch=0,
            grid=(N // bt,),
            in_specs=[
                pl.BlockSpec((2, HW), lambda i: (0, 0)),         # coord map
                pl.BlockSpec((bc, HW), lambda i: (i, 0)),        # x tile (residual too)
                pl.BlockSpec((bc, 9 * bc), lambda i: (0, 0)),    # block-diag weights
            ],
            out_specs=pl.BlockSpec((bc, HW), lambda i: (i, 0)),
        ),
        compiler_params=pltpu.CompilerParams(
            dimension_semantics=("parallel",),   # batch tiles are independent
        ),
    )(coords, x_flat, w_big)

    return out_flat.reshape(N, C, H, W)

    # TODO(synk): for stacked ResnetBlocks, fuse several blocks into one
    # pallas_call keeping the activation resident in VMEM (biggest real win).


def reference(x_nchw, w_oihw, b):
    """Pure-JAX reference matching the PyTorch forward (incl. conv bias)."""
    x = x_nchw.astype(jnp.float32)
    xpad = jnp.pad(x, ((0, 0), (0, 0), (1, 1), (1, 1)), mode="reflect")
    conv = jax.lax.conv_general_dilated(
        xpad, w_oihw.astype(jnp.float32),
        window_strides=(1, 1), padding="VALID",
        dimension_numbers=("NCHW", "OIHW", "NCHW"),
        precision=jax.lax.Precision.HIGHEST,
    )
    conv = conv + b.astype(jnp.float32)[None, :, None, None]
    mean = jnp.mean(conv, axis=(2, 3), keepdims=True)
    var = jnp.mean((conv - mean) ** 2, axis=(2, 3), keepdims=True)
    normed = (conv - mean) * jax.lax.rsqrt(var + EPS)
    return x + normed


if __name__ == "__main__":
    key = jax.random.PRNGKey(0)
    N, C, H, W = 2, 8, 16, 16  # dim = C = 8
    kx_, kw_, kb_ = jax.random.split(key, 3)

    x = jax.random.normal(kx_, (N, C, H, W), dtype=jnp.float32)
    # Conv2d(dim, dim, 3, bias=True) parameters (PyTorch-style uniform init).
    fan_in = C * 3 * 3
    bound = 1.0 / (fan_in ** 0.5)
    w = jax.random.uniform(kw_, (C, C, 3, 3), minval=-bound, maxval=bound,
                           dtype=jnp.float32)
    b = jax.random.uniform(kb_, (C,), minval=-bound, maxval=bound,
                           dtype=jnp.float32)

    out = jax.block_until_ready(resnet_block(x, w, b))
    ref = reference(x, w, b)

    assert out.shape == (N, C, H, W)
    # Tolerance covers any difference in f32-matmul pass decomposition between
    # the Mosaic MXU dot and the XLA conv; real logic bugs are O(0.1+).
    err = float(jnp.max(jnp.abs(out - ref)))
    assert err < 1e-3, err
    print("KERNEL_OK")
</pallas_src>

<mosaic_0001>
module attributes {stable_mosaic.version = 11 : i64} {
  func.func @kernel(%arg0: i32, %arg1: memref<2x256xi32, #tpu.memory_space<vmem>>, %arg2: memref<16x256xf32, #tpu.memory_space<vmem>>, %arg3: memref<16x144xf32, #tpu.memory_space<vmem>>, %arg4: memref<16x256xf32, #tpu.memory_space<vmem>>) attributes {dimension_semantics = [#tpu.dimension_semantics<parallel>], iteration_bounds = array<i64: 1>, scalar_prefetch = 0 : i64, scratch_operands = 0 : i64, tpu.core_type = #tpu.core_type<tc>, window_params = [{pipeline_mode = #tpu.pipeline_mode<synchronous>, transform_indices = @transform_0, window_bounds = array<i64: 2, 256>}, {transform_indices = @transform_1, window_bounds = array<i64: 16, 256>}, {pipeline_mode = #tpu.pipeline_mode<synchronous>, transform_indices = @transform_2, window_bounds = array<i64: 16, 144>}, {transform_indices = @transform_3, window_bounds = array<i64: 16, 256>}]} {
    %c0 = arith.constant 0 : index
    %c0_0 = arith.constant 0 : index
    %0 = vector.load %arg2[%c0, %c0_0] : memref<16x256xf32, #tpu.memory_space<vmem>>, vector<16x256xf32>
    %c0_1 = arith.constant 0 : index
    %c0_2 = arith.constant 0 : index
    %1 = vector.load %arg1[%c0_1, %c0_2] : memref<2x256xi32, #tpu.memory_space<vmem>>, vector<2x256xi32>
    %2 = vector.extract_strided_slice %1 {offsets = [0, 0], sizes = [1, 256], strides = [1, 1]} : vector<2x256xi32> to vector<1x256xi32>
    %3 = vector.shape_cast %2 : vector<1x256xi32> to vector<1x256xi32>
    %4 = vector.broadcast %3 : vector<1x256xi32> to vector<16x256xi32>
    %5 = vector.extract_strided_slice %1 {offsets = [1, 0], sizes = [1, 256], strides = [1, 1]} : vector<2x256xi32> to vector<1x256xi32>
    %6 = vector.shape_cast %5 : vector<1x256xi32> to vector<1x256xi32>
    %7 = vector.broadcast %6 : vector<1x256xi32> to vector<16x256xi32>
    %c0_i32 = arith.constant 0 : i32
    %8 = vector.broadcast %c0_i32 : i32 to vector<16x256xi32>
    %9 = arith.cmpi eq, %4, %8 : vector<16x256xi32>
    %c15_i32 = arith.constant 15 : i32
    %10 = vector.broadcast %c15_i32 : i32 to vector<16x256xi32>
    %11 = arith.cmpi eq, %4, %10 : vector<16x256xi32>
    %c0_i32_3 = arith.constant 0 : i32
    %12 = vector.broadcast %c0_i32_3 : i32 to vector<16x256xi32>
    %13 = arith.cmpi eq, %7, %12 : vector<16x256xi32>
    %c15_i32_4 = arith.constant 15 : i32
    %14 = vector.broadcast %c15_i32_4 : i32 to vector<16x256xi32>
    %15 = arith.cmpi eq, %7, %14 : vector<16x256xi32>
    %c255_i32 = arith.constant 255 : i32
    %16 = tpu.dynamic_rotate %0 by %c255_i32 dim 1 : vector<16x256xf32>, i32 -> vector<16x256xf32>
    %c1_i32 = arith.constant 1 : i32
    %17 = tpu.dynamic_rotate %0 by %c1_i32 dim 1 : vector<16x256xf32>, i32 -> vector<16x256xf32>
    %18 = arith.select %9, %16, %17 : vector<16x256xi1>, vector<16x256xf32>
    %19 = arith.select %11, %17, %16 : vector<16x256xi1>, vector<16x256xf32>
    %c240_i32 = arith.constant 240 : i32
    %20 = tpu.dynamic_rotate %18 by %c240_i32 dim 1 : vector<16x256xf32>, i32 -> vector<16x256xf32>
    %c16_i32 = arith.constant 16 : i32
    %21 = tpu.dynamic_rotate %18 by %c16_i32 dim 1 : vector<16x256xf32>, i32 -> vector<16x256xf32>
    %22 = arith.select %13, %20, %21 : vector<16x256xi1>, vector<16x256xf32>
    %23 = arith.select %15, %21, %20 : vector<16x256xi1>, vector<16x256xf32>
    %c240_i32_5 = arith.constant 240 : i32
    %24 = tpu.dynamic_rotate %0 by %c240_i32_5 dim 1 : vector<16x256xf32>, i32 -> vector<16x256xf32>
    %c16_i32_6 = arith.constant 16 : i32
    %25 = tpu.dynamic_rotate %0 by %c16_i32_6 dim 1 : vector<16x256xf32>, i32 -> vector<16x256xf32>
    %26 = arith.select %13, %24, %25 : vector<16x256xi1>, vector<16x256xf32>
    %27 = arith.select %15, %25, %24 : vector<16x256xi1>, vector<16x256xf32>
    %c240_i32_7 = arith.constant 240 : i32
    %28 = tpu.dynamic_rotate %19 by %c240_i32_7 dim 1 : vector<16x256xf32>, i32 -> vector<16x256xf32>
    %c16_i32_8 = arith.constant 16 : i32
    %29 = tpu.dynamic_rotate %19 by %c16_i32_8 dim 1 : vector<16x256xf32>, i32 -> vector<16x256xf32>
    %30 = arith.select %13, %28, %29 : vector<16x256xi1>, vector<16x256xf32>
    %31 = arith.select %15, %29, %28 : vector<16x256xi1>, vector<16x256xf32>
    %32 = tpu.concatenate %22, %18, %23, %26, %0, %27, %30, %19, %31 in 0 : vector<16x256xf32>, vector<16x256xf32>, vector<16x256xf32>, vector<16x256xf32>, vector<16x256xf32>, vector<16x256xf32>, vector<16x256xf32>, vector<16x256xf32>, vector<16x256xf32> -> vector<144x256xf32>
    %c0_9 = arith.constant 0 : index
    %c0_10 = arith.constant 0 : index
    %33 = vector.load %arg3[%c0_9, %c0_10] : memref<16x144xf32, #tpu.memory_space<vmem>>, vector<16x144xf32>
    %cst = arith.constant dense<0.000000e+00> : vector<16x256xf32>
    %34 = tpu.matmul %33, %32, %cst {dimension_numbers = #tpu.dot_dimension_numbers<[1], [0], [0], [1], [0, 0, 1, 1], [], []>, precision = #tpu.contract_precision<fp32>} : vector<16x144xf32>, vector<144x256xf32>, vector<16x256xf32> -> vector<16x256xf32>
    %cst_11 = arith.constant dense<0.000000e+00> : vector<16xf32>
    %35 = vector.multi_reduction <add>, %34, %cst_11 [1] : vector<16x256xf32> to vector<16xf32>
    %36 = vector.shape_cast %35 : vector<16xf32> to vector<16x1xf32>
    %cst_12 = arith.constant 3.906250e-03 : f32
    %37 = vector.broadcast %cst_12 : f32 to vector<16x1xf32>
    %38 = arith.mulf %36, %37 : vector<16x1xf32>
    %39 = vector.broadcast %38 : vector<16x1xf32> to vector<16x256xf32>
    %40 = arith.subf %34, %39 : vector<16x256xf32>
    %41 = arith.mulf %40, %40 : vector<16x256xf32>
    %cst_13 = arith.constant dense<0.000000e+00> : vector<16xf32>
    %42 = vector.multi_reduction <add>, %41, %cst_13 [1] : vector<16x256xf32> to vector<16xf32>
    %43 = vector.shape_cast %42 : vector<16xf32> to vector<16x1xf32>
    %cst_14 = arith.constant 3.906250e-03 : f32
    %44 = vector.broadcast %cst_14 : f32 to vector<16x1xf32>
    %45 = arith.mulf %43, %44 : vector<16x1xf32>
    %cst_15 = arith.constant 9.99999974E-6 : f32
    %46 = vector.broadcast %cst_15 : f32 to vector<16x1xf32>
    %47 = arith.addf %45, %46 : vector<16x1xf32>
    %48 = math.rsqrt %47 : vector<16x1xf32>
    %49 = vector.broadcast %48 : vector<16x1xf32> to vector<16x256xf32>
    %50 = arith.mulf %40, %49 : vector<16x256xf32>
    %51 = arith.addf %0, %50 : vector<16x256xf32>
    %c0_16 = arith.constant 0 : index
    %c0_17 = arith.constant 0 : index
    %52 = vector.load %arg4[%c0_16, %c0_17] : memref<16x256xf32, #tpu.memory_space<vmem>>, vector<16x256xf32>
    tpu.vector_store %arg4[%c0_16, %c0_17], %51 {strides = array<i32>} : memref<16x256xf32, #tpu.memory_space<vmem>>, vector<16x256xf32>,
    return
  }
  func.func @transform_0(%arg0: i32) -> (i32, i32) {
    %c0_i32 = arith.constant 0 : i32
    %c0_i32_0 = arith.constant 0 : i32
    %c0_i32_1 = arith.constant 0 : i32
    return %c0_i32, %c0_i32_0 : i32, i32
  }
  func.func @transform_1(%arg0: i32) -> (i32, i32) {
    %c0_i32 = arith.constant 0 : i32
    %c0_i32_0 = arith.constant 0 : i32
    return %arg0, %c0_i32 : i32, i32
  }
  func.func @transform_2(%arg0: i32) -> (i32, i32) {
    %c0_i32 = arith.constant 0 : i32
    %c0_i32_0 = arith.constant 0 : i32
    %c0_i32_1 = arith.constant 0 : i32
    return %c0_i32, %c0_i32_0 : i32, i32
  }
  func.func @transform_3(%arg0: i32) -> (i32, i32) {
    %c0_i32 = arith.constant 0 : i32
    %c0_i32_0 = arith.constant 0 : i32
    return %arg0, %c0_i32 : i32, i32
  }
}

</mosaic_0001>

<bundles_post_ra>
// kernel: tpu_custom_call.1
= control target key start
LH: loop header
LB: loop body
LE: loop exit
PB: predicated region body
PF: predicated region fallthrough
CT: control target
= control target key end

     0   :  { %8 = vsyncpa [#allocation3], 0  ;;  %s2582_s0 = inlined_call_operand.hbm [shape: s32[2,256], index: 0, kind: input, shape index: {}]   ;;  %s2583_s1 = inlined_call_operand.hbm [shape: f32[16,256], index: 1, kind: input, shape index: {}]   ;;  %s2584_s2 = inlined_call_operand.hbm [shape: f32[16,144], index: 2, kind: input, shape index: {}]   ;;  %s2585_s3 = inlined_call_operand.hbm [shape: f32[16,256], index: 3, kind: output, shape index: {}]  }
   0x1   :  { %9 = vsyncpa [#allocation6], 0 }
   0x2   :  { %10 = vsyncpa [#allocation4], 0  ;;  %s1631_s12 = smov [#allocation5]   ;;  %s1537_s16 = scalar_lea.hbm %s2583_s1, 512 }
   0x3   :  { %s26_s13 = sshll.u32 %s1631_s12, 4  ;;  %p1538_p0 = scmp.ne.s32.totalorder %s2583_s1, %s1537_s16  ;;  %s27_s13 = int_to_ptr.vmem [resolvable:$true] %s26_s13 }
   0x4   :  { %p1541_p1 = scmp.lt.u32.totalorder %s1537_s16, %s2583_s1 }
   0x6   :  { %p1543_p2 = pnand %p1541_p1, %p1538_p0 }
   0x8   :  { %1546 = shalt.err (!%p1543_p2)
}
   0x9   :  { %s1547_s21 = scalar_lea.vmem %s27_s13, 512  ;;  %p1552_p4 = scmp.lt.s32.totalorder %s27_s13, %s27_s13 }
   0xa   :  { %p1548_p3 = scmp.ne.s32.totalorder %s27_s13, %s1547_s21  ;;  %p1553_p5 = scmp.lt.s32.totalorder %s1547_s21, %s1547_s21 }
   0xc   :  { %p1554_p6 = por %p1553_p5, %p1552_p4 }
   0xe   :  { %p1555_p7 = pnand %p1554_p6, %p1548_p3 }
  0x10   :  { %1558 = shalt.err (!%p1555_p7)
}
  0x11   :  { %s1632_s22 = smov 256   ;;  %s1633_s23 = smov 16  }
  0x12   :  { %32 = dma.hbm_to_vmem [thread:$0]  %s2583_s1, 512, %s27_s13, [#allocation6], %s1632_s22, %s1632_s22, %s1633_s23  }
  0x13   :  { %s1634_s26 = smov [#allocation2]   ;;  %s1635_s28 = smov [#allocation7]  }
  0x14   :  { %s17_s27 = sshll.u32 %s1634_s26, 4  ;;  %s38_s29 = sshll.u32 %s1635_s28, 4  ;;  %s18_s27 = int_to_ptr.vmem [resolvable:$true] %s17_s27  ;;  %s39_s29 = int_to_ptr.vmem [resolvable:$true] %s38_s29 }
  0x15   :  { %s1559_s5 = scalar_lea.hbm %s2582_s0, 64 }
  0x16   :  { %p1560_p8 = scmp.ne.s32.totalorder %s2582_s0, %s1559_s5  ;;  %p1563_p9 = scmp.lt.u32.totalorder %s1559_s5, %s2582_s0 }
  0x18   :  { %p1565_p10 = pnand %p1563_p9, %p1560_p8 }
  0x1a   :  { %1568 = shalt.err (!%p1565_p10)
}
  0x1b   :  { %s1569_s1 = scalar_lea.vmem %s18_s27, 64  ;;  %p1574_p12 = scmp.lt.s32.totalorder %s18_s27, %s18_s27 }
  0x1c   :  { %p1570_p11 = scmp.ne.s32.totalorder %s18_s27, %s1569_s1  ;;  %p1575_p13 = scmp.lt.s32.totalorder %s1569_s1, %s1569_s1 }
  0x1e   :  { %p1576_p0 = por %p1575_p13, %p1574_p12 }
  0x20   :  { %p1577_p1 = pnand %p1576_p0, %p1570_p11 }
  0x22   :  { %1580 = shalt.err (!%p1577_p1)
}
  0x23   :  { %20 = dma.hbm_to_vmem [thread:$0]  %s2582_s0, 64, %s18_s27, [#allocation3]  }
  0x24   :  { %s1581_s14 = scalar_lea.hbm %s2584_s2, 512 }
  0x25   :  { %p1582_p2 = scmp.ne.s32.totalorder %s2584_s2, %s1581_s14  ;;  %p1585_p3 = scmp.lt.u32.totalorder %s1581_s14, %s2584_s2 }
  0x27   :  { %p1587_p4 = pnand %p1585_p3, %p1582_p2 }
  0x29   :  { %1590 = shalt.err (!%p1587_p4)
}
  0x2a   :  { %s1591_s19 = scalar_lea.vmem %s39_s29, 512  ;;  %p1596_p6 = scmp.lt.s32.totalorder %s39_s29, %s39_s29 }
  0x2b   :  { %p1592_p5 = scmp.ne.s32.totalorder %s39_s29, %s1591_s19  ;;  %p1597_p7 = scmp.lt.s32.totalorder %s1591_s19, %s1591_s19 }
  0x2d   :  { %p1598_p8 = por %p1597_p7, %p1596_p6 }
  0x2f   :  { %p1599_p9 = pnand %p1598_p8, %p1592_p5 }
  0x31   :  { %1602 = shalt.err (!%p1599_p9)
}
  0x32   :  { %44 = dma.hbm_to_vmem [thread:$0]  %s2584_s2, 512, %s39_s29, [#allocation6], %s1632_s22, %s1632_s22, %s1633_s23  }
  0x33   :  { %1625 = dma.done.wait [#allocation3], 64  }
  0x34   :  { %1626 = vsyncadd [#allocation3], 4294967232 }
  0x35   :  { %1627 = dma.done.wait [#allocation6], 1024  }
  0x36   :  { %1628 = vsyncadd [#allocation6], 4294966272  ;;  %v1702_v0 = vld [vmem:[#allocation5 + $0x8] sm:$0xff]  ;;  %v1704_v1 = vld [vmem:[#allocation5] sm:$0xff]  ;;  %s1636_s21 = smov 127   ;;  %s1637_s2 = smov 1   ;;  %v59_v4 = vlaneseq }
  0x37   :  { %103 = vrot.lane.b32.xlu1 %v1702_v0, %s1636_s21  ;;  %99 = vrot.lane.b32.xlu0 %v1704_v1, %s1636_s21  ;;  %v1708_v2 = vld [vmem:[#allocation5 + $0x18] sm:$0xff]  ;;  %v1710_v3 = vld [vmem:[#allocation5 + $0x10] sm:$0xff]  ;;  %s1638_s24 = smov 112   ;;  %vm237_vm6 = vcmask 130048   ;;  %s1639_s25 = smov [#allocation8]  }
  0x38   :  { %v1726_v5 = vshrl.u32 %v59_v4, 7  ;;  %v1730_v10 = vld [vmem:[#allocation2] sm:$0xf]  ;;  %v1734_v15 = vand.u32 127, %v59_v4  ;;  %s1271_s26 = sshll.u32 %s1639_s25, 4  ;;  %s1272_s26 = int_to_ptr.vmem [resolvable:$true] %s1271_s26 }
  0x39   :  { %s1603_s27 = scalar_lea.vmem %s1272_s26, 512  ;;  %p1608_p11 = scmp.lt.s32.totalorder %s1272_s26, %s1272_s26 }
  0x3a   :  { %v61_v6 = vsub.s32 0, %v1726_v5  ;;  %v65_v7 = vsub.s32 2, %v1726_v5  ;;  %vm109_vm0 = vcmp.lt.s32.totalorder %v1734_v15, 127  ;;  %vm122_vm1 = vcmp.lt.s32.totalorder %v1734_v15, 1  ;;  %p1604_p10 = scmp.ne.s32.totalorder %s1272_s26, %s1603_s27  ;;  %p1609_p12 = scmp.lt.s32.totalorder %s1603_s27, %s1603_s27 }
  0x3b   :  { %105 = vrot.lane.b32.xlu1 %v1708_v2, %s1636_s21  ;;  %101 = vrot.lane.b32.xlu0 %v1710_v3, %s1636_s21  ;;  %vm156_vm7 = vcmp.lt.s32.totalorder %v1734_v15, 16  ;;  %vm143_vm9 = vcmp.lt.s32.totalorder %v1734_v15, 112 }
  0x3c   :  { %v62_v11 = vrot.slane %v1730_v10, %v61_v6  ;;  %v66_v12 = vrot.slane %v1730_v10, %v65_v7  ;;  %p1610_p13 = por %p1609_p12, %p1608_p11 }
  0x3e   :  { %v70_v16 = vrot.slane %v62_v11, %v61_v6  ;;  %v74_v17 = vrot.slane %v66_v12, %v61_v6  ;;  %p1611_p0 = pnand %p1610_p13, %p1604_p10 }
  0x3f   :  { %116 = vrot.lane.b32.xlu1 %v1710_v3, %s1637_s2  ;;  %114 = vrot.lane.b32.xlu0 %v1704_v1, %s1637_s2 }
  0x40   :  { %vm91_vm2 = vcmp.eq.s32.totalorder %v70_v16, 0  ;;  %vm92_vm3 = vcmp.eq.s32.totalorder %v74_v17, 0  ;;  %vm93_vm4 = vcmp.eq.s32.totalorder %v70_v16, 15  ;;  %vm94_vm5 = vcmp.eq.s32.totalorder %v74_v17, 15 }
  0x43   :  { %120 = vrot.lane.b32.xlu1 %v1708_v2, %s1637_s2  ;;  %118 = vrot.lane.b32.xlu0 %v1702_v0, %s1637_s2 }
  0x47   :  { %171 = vrot.lane.b32.xlu1 %v1710_v3, %s1638_s24  ;;  %169 = vrot.lane.b32.xlu0 %v1704_v1, %s1638_s24 }
  0x4b   :  { %175 = vrot.lane.b32.xlu1 %v1708_v2, %s1638_s24  ;;  %173 = vrot.lane.b32.xlu0 %v1702_v0, %s1638_s24 }
  0xa9   :  { %v104_v8 = vpop.permute.xlu1 %103  ;;  %v100_v9 = vpop.permute.xlu0 %99 }
  0xaa   :  { %v110_v20 = vsel %vm109_vm0, %v100_v9, %v104_v8  ;;  %v112_v21 = vsel %vm109_vm0, %v104_v8, %v100_v9 }
  0xad   :  { %v106_v13 = vpop.permute.xlu1 %105  ;;  %v102_v14 = vpop.permute.xlu0 %101 }
  0xae   :  { %v111_v22 = vsel %vm109_vm0, %v102_v14, %v106_v13  ;;  %v113_v23 = vsel %vm109_vm0, %v106_v13, %v102_v14 }
  0xb1   :  { %v117_v18 = vpop.permute.xlu1 %116  ;;  %v115_v19 = vpop.permute.xlu0 %114 }
  0xb5   :  { %v121_v24 = vpop.permute.xlu1 %120  ;;  %v119_v25 = vpop.permute.xlu0 %118 }
  0xb6   :  { %v124_v26 = vsel %vm122_vm1, %v117_v18, %v121_v24  ;;  %v126_v27 = vsel %vm122_vm1, %v121_v24, %v117_v18  ;;  %v123_v28 = vsel %vm122_vm1, %v115_v19, %v119_v25  ;;  %v125_v29 = vsel %vm122_vm1, %v119_v25, %v115_v19 }
  0xb7   :  { %v129_v30 = vsel %vm91_vm2, %v111_v22, %v126_v27  ;;  %v127_v31 = vsel %vm91_vm2, %v110_v20, %v125_v29  ;;  %v130_v32 = vsel %vm92_vm3, %v113_v23, %v124_v26  ;;  %v128_v33 = vsel %vm92_vm3, %v112_v21, %v123_v28 }
  0xb8   :  { %137 = vrot.lane.b32.xlu1 %v129_v30, %s1638_s24  ;;  %135 = vrot.lane.b32.xlu0 %v127_v31, %s1638_s24  ;;  %v252_v34 = vand.u32 4294901760, %v128_v33  ;;  %v1743_v35 = vsel %vm94_vm5, %v124_v26, %v113_v23  ;;  %v1746_v36 = vsel %vm94_vm5, %v123_v28, %v112_v21  ;;  %v256_v37 = vand.u32 4294901760, %v130_v32 }
  0xb9   :  { %v1749_v38 = vsel %vm93_vm4, %v125_v29, %v110_v20  ;;  %v254_v39 = vand.u32 4294901760, %v127_v31  ;;  %v258_v40 = vand.u32 4294901760, %v129_v30  ;;  %v300_v41 = vand.u32 4294901760, %v1746_v36 }
  0xba   :  { %v1753_v42 = vsel %vm93_vm4, %v126_v27, %v111_v22  ;;  %v1755_v43 = vsub.f32 %v128_v33, %v252_v34  ;;  %v1759_v44 = vpack.c.bf16 %v256_v37, %v252_v34  ;;  %v1761_v45 = vsub.f32 %v130_v32, %v256_v37 }
  0xbb   :  { %v1763_v46 = vpack.c.bf16 %v258_v40, %v254_v39  ;;  %v304_v47 = vand.u32 4294901760, %v1743_v35  ;;  %v1766_v48 = vsub.f32 %v127_v31, %v254_v39  ;;  %v1768_v49 = vsub.f32 %v129_v30, %v258_v40  ;;  %v234_v40 = vld [vmem:[#allocation7 + $0x8] sm:$0xff] }
  0xbc   :  { %2630 = vst [vmem:[#allocation12_spill] sm:$0xff] %v1755_v43  ;;  %141 = vrot.lane.b32.xlu1 %v130_v32, %s1638_s24  ;;  %139 = vrot.lane.b32.xlu0 %v128_v33, %s1638_s24  ;;  %2631 = vst [vmem:[#allocation13_spill] sm:$0xff] %v1759_v44  ;;  %v1771_v50 = vsub.f32 %v1746_v36, %v300_v41  ;;  %v302_v51 = vand.u32 4294901760, %v1749_v38  ;;  %v306_v54 = vand.u32 4294901760, %v1753_v42  ;;  %v403_v56 = vand.u32 4294901760, %v1755_v43 }
  0xbd   :  { %2632 = vst [vmem:[#allocation14_spill] sm:$0xff] %v1761_v45  ;;  %2633 = vst [vmem:[#allocation15_spill] sm:$0xff] %v1763_v46  ;;  %v1774_v52 = vpack.c.bf16 %v304_v47, %v300_v41  ;;  %v1777_v53 = vsub.f32 %v1743_v35, %v304_v47  ;;  %v415_v57 = vand.u32 4294901760, %v1761_v45  ;;  %v409_v58 = vand.u32 4294901760, %v1766_v48 }
  0xbe   :  { %2634 = vst [vmem:[#allocation16_spill] sm:$0xff] %v1766_v48  ;;  %2635 = vst [vmem:[#allocation17_spill] sm:$0xff] %v1768_v49  ;;  %v1781_v55 = vsub.f32 %v1749_v38, %v302_v51  ;;  %v421_v59 = vand.u32 4294901760, %v1768_v49  ;;  %v1789_v60 = vpack.c.bf16 %v306_v54, %v302_v51  ;;  %v1792_v61 = vsub.f32 %v1753_v42, %v306_v54 }
  0xbf   :  { %2636 = vst [vmem:[#allocation18_spill] sm:$0xff] %v1771_v50  ;;  %2637 = vst [vmem:[#allocation19_spill] sm:$0xff] %v1774_v52  ;;  %v547_v62 = vand.u32 4294901760, %v1771_v50  ;;  %v559_v63 = vand.u32 4294901760, %v1777_v53  ;;  %v404_v4 = vsub.f32 %v1755_v43, %v403_v56  ;;  %v416_v6 = vsub.f32 %v1761_v45, %v415_v57 }
  0xc0   :  { %2638 = vst [vmem:[#allocation20_spill] sm:$0xff] %v1777_v53  ;;  %2639 = vst [vmem:[#allocation21_spill] sm:$0xff] %v1781_v55  ;;  %150 = vrot.lane.b32.xlu1 %v129_v30, %s1633_s23  ;;  %148 = vrot.lane.b32.xlu0 %v127_v31, %s1633_s23  ;;  %v1798_v7 = vpack.c.bf16 %v415_v57, %v403_v56  ;;  %v410_v8 = vsub.f32 %v1766_v48, %v409_v58  ;;  %v553_v22 = vand.u32 4294901760, %v1781_v55  ;;  %v1864_v56 = vpop.permute.xlu0 %169 }
  0xc1   :  { %2640 = vst [vmem:[#allocation22_spill] sm:$0xff] %v1789_v60  ;;  %2641 = vst [vmem:[#allocation23_spill] sm:$0xff] %v1792_v61  ;;  %v422_v9 = vsub.f32 %v1768_v49, %v421_v59  ;;  %v1802_v11 = vpack.c.bf16 %v421_v59, %v409_v58  ;;  %v548_v12 = vsub.f32 %v1771_v50, %v547_v62  ;;  %v405_v14 = vand.u32 4294901760, %v404_v4 }
  0xc2   :  { %v560_v13 = vsub.f32 %v1777_v53, %v559_v63  ;;  %v417_v16 = vand.u32 4294901760, %v416_v6  ;;  %v411_v17 = vand.u32 4294901760, %v410_v8  ;;  %v1808_v18 = vpack.c.bf16 %v559_v63, %v547_v62 }
  0xc3   :  { %v423_v19 = vand.u32 4294901760, %v422_v9  ;;  %v549_v20 = vand.u32 4294901760, %v548_v12  ;;  %v565_v24 = vand.u32 4294901760, %v1792_v61  ;;  %v554_v29 = vsub.f32 %v1781_v55, %v553_v22 }
  0xc4   :  { %154 = vrot.lane.b32.xlu1 %v130_v32, %s1633_s23  ;;  %152 = vrot.lane.b32.xlu0 %v128_v33, %s1633_s23  ;;  %v561_v21 = vand.u32 4294901760, %v560_v13  ;;  %v1811_v23 = vpack.c.bf16 %v417_v16, %v405_v14  ;;  %v239_v41 = vsel %vm237_vm6, %v234_v40, 0  ;;  %v174_v57 = vpop.permute.xlu0 %173  ;;  %v81_v58 = vsub.s32 3, %v1726_v5  ;;  %v233_v33 = vld [vmem:[#allocation7] sm:$0xff] }
  0xc5   :  { %v1818_v27 = vpack.c.bf16 %v423_v19, %v411_v17  ;;  %v566_v31 = vsub.f32 %v1792_v61, %v565_v24  ;;  %v1830_v32 = vpack.c.bf16 %v565_v24, %v553_v22  ;;  %v555_v34 = vand.u32 4294901760, %v554_v29  ;;  %v236_v61 = vld [vmem:[#allocation7 + $0x18] sm:$0xff] }
  0xc6   :  { %v1820_v28 = vpack.c.bf16 %v561_v21, %v549_v20  ;;  %v1857_v47 = vand.u32 4294901760, %v239_v41  ;;  %v77_v63 = vsub.s32 1, %v1726_v5  ;;  %v82_v4 = vrot.slane %v1730_v10, %v81_v58 }
  0xc7   :  { %v567_v37 = vand.u32 4294901760, %v566_v31  ;;  %v177_v25 = vsel %vm143_vm9, %v1864_v56, %v174_v57  ;;  %v2657_v48 = vand.u32 4294901760, %v1710_v3 }
  0xc8   :  { %183 = vrot.lane.b32.xlu1 %v1710_v3, %s1633_s23  ;;  %181 = vrot.lane.b32.xlu0 %v1704_v1, %s1633_s23  ;;  %v1860_v51 = vsub.f32 %v239_v41, %v1857_v47  ;;  %v78_v9 = vrot.slane %v1730_v10, %v77_v63  ;;  %v1870_v12 = vrot.slane %v82_v4, %v77_v63 }
  0xc9   :  { %v1838_v39 = vpack.c.bf16 %v567_v37, %v555_v34 }
  0xca   :  { %2642 = vst [vmem:[#allocation24_spill] sm:$0xff] %v1860_v51  ;;  %v1873_v16 = vrot.slane %v78_v9, %v77_v63  ;;  %vm96_vm8 = vcmp.eq.s32.totalorder %v1870_v12, 0  ;;  %vm98_vm11 = vcmp.eq.s32.totalorder %v1870_v12, 15 }
  0xcc   :  { %187 = vrot.lane.b32.xlu1 %v1708_v2, %s1633_s23  ;;  %185 = vrot.lane.b32.xlu0 %v1702_v0, %s1633_s23  ;;  %vm95_vm10 = vcmp.eq.s32.totalorder %v1873_v16, 0  ;;  %vm97_vm12 = vcmp.eq.s32.totalorder %v1873_v16, 15 }
  0xd0   :  { %203 = vrot.lane.b32.xlu1 %v1753_v42, %s1638_s24  ;;  %201 = vrot.lane.b32.xlu0 %v1749_v38, %s1638_s24 }
  0xd4   :  { %207 = vrot.lane.b32.xlu1 %v1743_v35, %s1638_s24  ;;  %205 = vrot.lane.b32.xlu0 %v1746_v36, %s1638_s24 }
  0xd8   :  { %215 = vrot.lane.b32.xlu1 %v1753_v42, %s1633_s23  ;;  %213 = vrot.lane.b32.xlu0 %v1749_v38, %s1633_s23  ;;  %v346_v42 = vand.u32 4294901760, %v1860_v51 }
  0xda   :  { %v347_v54 = vsub.f32 %v1860_v51, %v346_v42  ;;  %898 = vmatprep.mubr.f32.mxu0 %v346_v42  ;;  %v2653_v51 = vand.u32 4294901760, %v1702_v0 }
  0xdc   :  { %219 = vrot.lane.b32.xlu1 %v1743_v35, %s1633_s23  ;;  %217 = vrot.lane.b32.xlu0 %v1746_v36, %s1633_s23  ;;  %v348_v38 = vand.u32 4294901760, %v347_v54  ;;  %v172_v35 = vpop.permute.xlu1 %171 }
  0xde   :  { %349 = vmatprep.mubr.f32.mxu1 %v348_v38 }
  0xe0   :  { %v176_v36 = vpop.permute.xlu1 %175 }
 0x12a   :  { %v138_v59 = vpop.permute.xlu1 %137  ;;  %v136_v62 = vpop.permute.xlu0 %135 }
 0x12e   :  { %v142_v6 = vpop.permute.xlu1 %141  ;;  %v140_v8 = vpop.permute.xlu0 %139 }
 0x12f   :  { %v147_v19 = vsel %vm143_vm9, %v142_v6, %v138_v59  ;;  %v146_v22 = vsel %vm143_vm9, %v140_v8, %v136_v62  ;;  %v145_v40 = vsel %vm143_vm9, %v138_v59, %v142_v6  ;;  %v144_v41 = vsel %vm143_vm9, %v136_v62, %v140_v8 }
 0x132   :  { %v151_v13 = vpop.permute.xlu1 %150  ;;  %v149_v14 = vpop.permute.xlu0 %148 }
 0x136   :  { %v155_v17 = vpop.permute.xlu1 %154  ;;  %v153_v5 = vpop.permute.xlu0 %152 }
 0x137   :  { %v158_v10 = vsel %vm156_vm7, %v151_v13, %v155_v17  ;;  %v157_v20 = vsel %vm156_vm7, %v149_v14, %v153_v5  ;;  %v160_v24 = vsel %vm156_vm7, %v155_v17, %v151_v13  ;;  %v159_v29 = vsel %vm156_vm7, %v153_v5, %v149_v14 }
 0x138   :  { %v1885_v21 = vsel %vm96_vm8, %v147_v19, %v158_v10  ;;  %v1896_v31 = vsel %vm96_vm8, %v146_v22, %v157_v20  ;;  %v1905_v54 = vsel %vm95_vm10, %v145_v40, %v160_v24  ;;  %v1909_v38 = vsel %vm95_vm10, %v144_v41, %v159_v29 }
 0x139   :  { %v2589_v42 = vand.u32 4294901760, %v1885_v21  ;;  %v2588_v58 = vand.u32 4294901760, %v1896_v31  ;;  %v2587_v59 = vand.u32 4294901760, %v1905_v54  ;;  %v2586_v62 = vand.u32 4294901760, %v1909_v38 }
 0x13a   :  { %v184_v34 = vpop.permute.xlu1 %183  ;;  %v182_v37 = vpop.permute.xlu0 %181  ;;  %v1924_v8 = vsel %vm98_vm11, %v158_v10, %v147_v19  ;;  %v1928_v9 = vsel %vm98_vm11, %v157_v20, %v146_v22  ;;  %v178_v13 = vsel %vm143_vm9, %v172_v35, %v176_v36  ;;  %v180_v14 = vsel %vm143_vm9, %v176_v36, %v172_v35 }
 0x13b   :  { %v1919_v6 = vpack.c.bf16 %v2589_v42, %v2588_v58  ;;  %v179_v17 = vsel %vm143_vm9, %v174_v57, %v1864_v56  ;;  %v1947_v20 = vsel %vm97_vm12, %v160_v24, %v145_v40  ;;  %v2593_v22 = vand.u32 4294901760, %v1924_v8 }
 0x13c   :  { %v1954_v35 = vpack.c.bf16 %v2587_v59, %v2586_v62  ;;  %v1960_v30 = vsel %vm97_vm12, %v159_v29, %v144_v41  ;;  %v2592_v26 = vand.u32 4294901760, %v1928_v9 }
 0x13d   :  { %2643 = vst [vmem:[#allocation25_spill] sm:$0xff] %v1919_v6  ;;  %1285 = vmatprep.subr.bf16.mxu1 %v1919_v6  ;;  %1393 = vmatprep.subr.bf16.mxu0 %v1919_v6 }
 0x13e   :  { %v188_v63 = vpop.permute.xlu1 %187  ;;  %v186_v4 = vpop.permute.xlu0 %185  ;;  %2644 = vst [vmem:[#allocation26_spill] sm:$0xff] %v1954_v35  ;;  %1287 = vmatpush1.bf16.msra.mxu1 %v1954_v35  ;;  %1395 = vmatpush1.bf16.msra.mxu0 %v1954_v35  ;;  %v2003_v41 = vpack.c.bf16 %v2593_v22, %v2592_v26  ;;  %v2647_v22 = vand.u32 4294901760, %v1960_v30 }
 0x13f   :  { %v190_v5 = vsel %vm156_vm7, %v184_v34, %v188_v63  ;;  %v189_v36 = vsel %vm156_vm7, %v182_v37, %v186_v4  ;;  %v192_v24 = vsel %vm156_vm7, %v188_v63, %v184_v34  ;;  %v191_v40 = vsel %vm156_vm7, %v186_v4, %v182_v37  ;;  %1289 = vmatprep.subr.bf16.mxu1 %v1759_v44 }
 0x140   :  { %v1972_v62 = vsel %vm96_vm8, %v180_v14, %v190_v5  ;;  %v1978_v29 = vsel %vm96_vm8, %v179_v17, %v189_v36  ;;  %1397 = vmatprep.subr.bf16.mxu0 %v1759_v44  ;;  %v1985_v63 = vand.u32 4294901760, %v233_v33  ;;  %v1991_v58 = vsel %vm95_vm10, %v178_v13, %v192_v24  ;;  %2646 = vst [vmem:[#allocation28_spill] sm:$0xff] %v2003_v41 }
 0x141   :  { %v1995_v42 = vsel %vm95_vm10, %v177_v25, %v191_v40  ;;  %v2648_v4 = vand.u32 4294901760, %v1947_v20  ;;  %v2650_v59 = vand.u32 4294901760, %v1978_v29  ;;  %v2651_v55 = vand.u32 4294901760, %v1972_v62 }
 0x142   :  { %v1941_v19 = vpop.permute.xlu1 %203  ;;  %v1943_v10 = vpop.permute.xlu0 %201  ;;  %2645 = vst [vmem:[#allocation27_spill] sm:$0xff] %v1985_v63  ;;  %1291 = vmatpush1.bf16.msra.mxu1 %v1763_v46  ;;  %1399 = vmatpush1.bf16.msra.mxu0 %v1763_v46  ;;  %v2013_v26 = vsub.f32 %v233_v33, %v1985_v63  ;;  %v2656_v33 = vand.u32 4294901760, %v1704_v1 }
 0x143   :  { %1293 = vmatprep.subr.bf16.mxu1 %v2003_v41  ;;  %1401 = vmatprep.subr.bf16.mxu0 %v2003_v41  ;;  %v2019_v50 = vpack.c.bf16 %v2648_v4, %v2647_v22  ;;  %v2025_v53 = vpack.c.bf16 %v2651_v55, %v2650_v59  ;;  %v2654_v41 = vand.u32 4294901760, %v1708_v2  ;;  %v2659_v22 = vand.u32 4294901760, %v1885_v21 }
 0x144   :  { %v2037_v49 = vpack.c.bf16 %v2657_v48, %v2656_v33  ;;  %v2046_v55 = vsel %vm98_vm11, %v190_v5, %v180_v14  ;;  %v2050_v59 = vsel %vm98_vm11, %v189_v36, %v179_v17  ;;  %v242_v48 = vsel %vm237_vm6, %v236_v61, 0 }
 0x145   :  { %2649 = vst [vmem:[#allocation29_spill] sm:$0xff] %v2019_v50  ;;  %2652 = vst [vmem:[#allocation30_spill] sm:$0xff] %v2025_v53  ;;  %v2031_v46 = vpack.c.bf16 %v2654_v41, %v2653_v51  ;;  %v2042_v4 = vsub.f32 %v1885_v21, %v2659_v22  ;;  %v2057_v51 = vsel %vm97_vm12, %v192_v24, %v178_v13  ;;  %v2661_v14 = vand.u32 4294901760, %v1995_v42 }
 0x146   :  { %v208_v34 = vpop.permute.xlu1 %207  ;;  %v206_v37 = vpop.permute.xlu0 %205  ;;  %2658 = vst [vmem:[#allocation32_spill] sm:$0xff] %v2037_v49  ;;  %1295 = vmatpush1.bf16.msra.mxu1 %v2019_v50  ;;  %1403 = vmatpush1.bf16.msra.mxu0 %v2019_v50  ;;  %v2662_v17 = vand.u32 4294901760, %v1991_v58  ;;  %v2668_v50 = vand.u32 4294901760, %v2046_v55  ;;  %v2670_v43 = vand.u32 4294901760, %v2013_v26 }
 0x147   :  { %2655 = vst [vmem:[#allocation31_spill] sm:$0xff] %v2031_v46  ;;  %2660 = vst [vmem:[#allocation33_spill] sm:$0xff] %v2042_v4  ;;  %v212_v21 = vsel %vm143_vm9, %v208_v34, %v1941_v19  ;;  %1297 = vmatprep.subr.bf16.mxu1 %v2025_v53  ;;  %1405 = vmatprep.subr.bf16.mxu0 %v2025_v53 }
 0x148   :  { %v2068_v5 = vpack.c.bf16 %v2662_v17, %v2661_v14  ;;  %v2086_v17 = vsel %vm97_vm12, %v191_v40, %v177_v25  ;;  %v235_v25 = vld [vmem:[#allocation7 + $0x10] sm:$0xff]  ;;  %v2140_v45 = vsub.f32 %v2013_v26, %v2670_v43  ;;  %v2673_v43 = vand.u32 4294901760, %v1905_v54 }
 0x14a   :  { %v216_v56 = vpop.permute.xlu1 %215  ;;  %v214_v57 = vpop.permute.xlu0 %213  ;;  %2663 = vst [vmem:[#allocation34_spill] sm:$0xff] %v2068_v5  ;;  %1299 = vmatpush1.bf16.msra.mxu1 %v2068_v5  ;;  %1407 = vmatpush1.bf16.msra.mxu0 %v2068_v5  ;;  %v2667_v5 = vand.u32 4294901760, %v2050_v59  ;;  %v2161_v14 = vsub.f32 %v1905_v54, %v2673_v43 }
 0x14b   :  { %1301 = vmatprep.subr.bf16.mxu1 %v2031_v46  ;;  %1409 = vmatprep.subr.bf16.mxu0 %v2031_v46  ;;  %v2152_v46 = vsub.f32 %v1708_v2, %v2654_v41  ;;  %v2675_v2 = vand.u32 4294901760, %v1704_v1 }
 0x14c   :  { %v2135_v44 = vpack.c.bf16 %v2668_v50, %v2667_v5  ;;  %v2676_v50 = vand.u32 4294901760, %v2086_v17  ;;  %v2677_v5 = vand.u32 4294901760, %v2057_v51 }
 0x14d   :  { %v2171_v41 = vsub.f32 %v1704_v1, %v2675_v2  ;;  %v391_v1 = vand.u32 4294901760, %v2042_v4  ;;  %v2682_v2 = vand.u32 4294901760, %v1710_v3 }
 0x14e   :  { %v220_v36 = vpop.permute.xlu1 %219  ;;  %v218_v61 = vpop.permute.xlu0 %217  ;;  %2669 = vst [vmem:[#allocation37_spill] sm:$0xff] %v2135_v44  ;;  %1303 = vmatpush1.bf16.msra.mxu1 %v2037_v49  ;;  %1411 = vmatpush1.bf16.msra.mxu0 %v2037_v49  ;;  %v2179_v54 = vpack.c.bf16 %v2677_v5, %v2676_v50 }
 0x14f   :  { %v222_v13 = vsel %vm156_vm7, %v216_v56, %v220_v36  ;;  %v2075_v24 = vsel %vm156_vm7, %v220_v36, %v216_v56  ;;  %v221_v33 = vsel %vm156_vm7, %v214_v57, %v218_v61  ;;  %v2081_v22 = vsel %vm156_vm7, %v218_v61, %v214_v57  ;;  %1305 = vmatprep.subr.bf16.mxu1 %v2135_v44 }
 0x150   :  { %v2091_v53 = vsel %vm96_vm8, %v212_v21, %v222_v13  ;;  %v210_v56 = vsel %vm143_vm9, %v1941_v19, %v208_v34  ;;  %v209_v57 = vsel %vm143_vm9, %v1943_v10, %v206_v37  ;;  %v211_v36 = vsel %vm143_vm9, %v206_v37, %v1943_v10  ;;  %1413 = vmatprep.subr.bf16.mxu0 %v2135_v44 }
 0x151   :  { %v2109_v19 = vsel %vm95_vm10, %v210_v56, %v2075_v24  ;;  %v2114_v40 = vsel %vm95_vm10, %v209_v57, %v2081_v22  ;;  %v2118_v15 = vsel %vm96_vm8, %v211_v36, %v221_v33  ;;  %v2120_v10 = vand.u32 4294901760, %v242_v48  ;;  %2678 = vst [vmem:[#allocation39_spill] sm:$0xff] %v2179_v54 }
 0x152   :  { %v2665_v34 = vand.u32 4294901760, %v1896_v31  ;;  %v2679_v43 = vand.u32 4294901760, %v2118_v15  ;;  %v2192_v44 = vsub.f32 %v1710_v3, %v2682_v2  ;;  %1307 = vmatpush1.bf16.msra.mxu1 %v2179_v54  ;;  %1415 = vmatpush1.bf16.msra.mxu0 %v2179_v54  ;;  %v2683_v3 = vand.u32 4294901760, %v2114_v40 }
 0x153   :  { %2664 = vst [vmem:[#allocation35_spill] sm:$0xff] %v2120_v10  ;;  %v2196_v50 = vsub.f32 %v242_v48, %v2120_v10  ;;  %v2684_v48 = vand.u32 4294901760, %v2109_v19  ;;  %v392_v35 = vsub.f32 %v2042_v4, %v391_v1 }
 0x154   :  { %v2125_v37 = vsub.f32 %v1896_v31, %v2665_v34  ;;  %v2142_v31 = vand.u32 4294901760, %v235_v25  ;;  %v2672_v34 = vand.u32 4294901760, %v1702_v0 }
 0x155   :  { %v2215_v2 = vpack.c.bf16 %v2684_v48, %v2683_v3  ;;  %v393_v54 = vand.u32 4294901760, %v392_v35 }
 0x156   :  { %2666 = vst [vmem:[#allocation36_spill] sm:$0xff] %v2125_v37  ;;  %2671 = vst [vmem:[#allocation38_spill] sm:$0xff] %v2142_v31  ;;  %v2147_v61 = vsub.f32 %v1702_v0, %v2672_v34  ;;  %v2674_v0 = vand.u32 4294901760, %v1909_v38  ;;  %v379_v49 = vand.u32 4294901760, %v2125_v37  ;;  %v2199_v5 = vsub.f32 %v235_v25, %v2142_v31 }
 0x157   :  { %2685 = vst [vmem:[#allocation41_spill] sm:$0xff] %v2215_v2 }
 0x158   :  { %v2166_v34 = vsub.f32 %v1909_v38, %v2674_v0  ;;  %v2680_v38 = vand.u32 4294901760, %v2091_v53  ;;  %v380_v48 = vsub.f32 %v2125_v37, %v379_v49 }
 0x15a   :  { %v2185_v0 = vpack.c.bf16 %v2680_v38, %v2679_v43  ;;  %v2203_v43 = vsel %vm98_vm11, %v222_v13, %v212_v21  ;;  %v2207_v38 = vsel %vm98_vm11, %v221_v33, %v211_v36  ;;  %v2686_v21 = vand.u32 4294901760, %v1924_v8 }
 0x15b   :  { %v2687_v36 = vand.u32 4294901760, %v1928_v9  ;;  %v2245_v33 = vsel %vm97_vm12, %v2081_v22, %v209_v57  ;;  %v2691_v57 = vand.u32 4294901760, %v2161_v14  ;;  %v2693_v13 = vand.u32 4294901760, %v1960_v30 }
 0x15c   :  { %2681 = vst [vmem:[#allocation40_spill] sm:$0xff] %v2185_v0  ;;  %v2222_v12 = vsub.f32 %v1924_v8, %v2686_v21  ;;  %1309 = vmatprep.subr.bf16.mxu1 %v2185_v0  ;;  %1417 = vmatprep.subr.bf16.mxu0 %v2185_v0  ;;  %v2239_v21 = vsel %vm97_vm12, %v2075_v24, %v210_v56  ;;  %v2690_v24 = vand.u32 4294901760, %v2147_v61  ;;  %v2694_v22 = vand.u32 4294901760, %v1972_v62 }
 0x15d   :  { %v2231_v3 = vsub.f32 %v1928_v9, %v2687_v36  ;;  %v2689_v36 = vand.u32 4294901760, %v1947_v20  ;;  %1311 = vmatpush1.bf16.msra.mxu1 %v2215_v2  ;;  %1419 = vmatpush1.bf16.msra.mxu0 %v2215_v2  ;;  %v398_v8 = vsub.f32 %v2161_v14, %v2691_v57  ;;  %v2271_v9 = vsub.f32 %v1960_v30, %v2693_v13 }
 0x15e   :  { %v2258_v56 = vsub.f32 %v2147_v61, %v2690_v24  ;;  %1313 = vmatprep.subr.bf16.mxu1 %v1774_v52  ;;  %1421 = vmatprep.subr.bf16.mxu0 %v1774_v52  ;;  %v2279_v16 = vsub.f32 %v1972_v62, %v2694_v22  ;;  %v2695_v57 = vand.u32 4294901760, %v1978_v29  ;;  %v2623_v30 = vand.u32 4294901760, %v2245_v33 }
 0x15f   :  { %2688 = vst [vmem:[#allocation42_spill] sm:$0xff] %v2231_v3  ;;  %v2251_v25 = vsub.f32 %v1947_v20, %v2689_v36  ;;  %v2692_v20 = vand.u32 4294901760, %v2166_v34  ;;  %v2696_v13 = vand.u32 4294901760, %v2207_v38  ;;  %v2697_v52 = vand.u32 4294901760, %v2203_v43 }
 0x160   :  { %v381_v24 = vand.u32 4294901760, %v380_v48  ;;  %v427_v62 = vand.u32 4294901760, %v2231_v3  ;;  %v2699_v22 = vand.u32 4294901760, %v1991_v58  ;;  %v2701_v48 = vand.u32 4294901760, %v2199_v5 }
 0x161   :  { %v386_v36 = vsub.f32 %v2166_v34, %v2692_v20  ;;  %v2284_v20 = vsub.f32 %v1978_v29, %v2695_v57  ;;  %v2292_v0 = vpack.c.bf16 %v2697_v52, %v2696_v13  ;;  %1315 = vmatpush1.bf16.msra.mxu1 %v1789_v60  ;;  %1423 = vmatpush1.bf16.msra.mxu0 %v1789_v60  ;;  %v2700_v57 = vand.u32 4294901760, %v2196_v50 }
 0x162   :  { %v2298_v31 = vsub.f32 %v1991_v58, %v2699_v22  ;;  %v369_v35 = vsub.f32 %v2199_v5, %v2701_v48  ;;  %v2702_v58 = vand.u32 4294901760, %v1995_v42  ;;  %v1428_v29 = vpack.c.bf16 %v391_v1, %v379_v49 }
 0x163   :  { %2698 = vst [vmem:[#allocation43_spill] sm:$0xff] %v2292_v0  ;;  %v363_v52 = vsub.f32 %v2196_v50, %v2700_v57  ;;  %1317 = vmatprep.subr.bf16.mxu1 %v2292_v0  ;;  %1425 = vmatprep.subr.bf16.mxu0 %v2292_v0  ;;  %v2703_v57 = vand.u32 4294901760, %v2239_v21  ;;  %v387_v48 = vand.u32 4294901760, %v386_v36  ;;  %v399_v13 = vand.u32 4294901760, %v398_v8 }
 0x164   :  { %v2314_v22 = vsub.f32 %v1995_v42, %v2702_v58  ;;  %v2705_v2 = vand.u32 4294901760, %v2222_v12  ;;  %v1320_v63 = vpack.c.bf16 %v393_v54, %v381_v24  ;;  %v428_v42 = vsub.f32 %v2231_v3, %v427_v62 }
 0x165   :  { %v2322_v60 = vpack.c.bf16 %v2703_v57, %v2623_v30  ;;  %v451_v58 = vand.u32 4294901760, %v2284_v20  ;;  %v463_v0 = vand.u32 4294901760, %v2279_v16  ;;  %v2706_v1 = vand.u32 4294901760, %v2152_v46 }
 0x166   :  { %v440_v10 = vsub.f32 %v2222_v12, %v2705_v2  ;;  %v2707_v2 = vand.u32 4294901760, %v2171_v41  ;;  %v364_v36 = vand.u32 4294901760, %v363_v52  ;;  %v2708_v24 = vand.u32 4294901760, %v2251_v25 }
 0x167   :  { %2704 = vst [vmem:[#allocation44_spill] sm:$0xff] %v2322_v60  ;;  %1319 = vmatpush1.bf16.msra.mxu1 %v2322_v60  ;;  %1427 = vmatpush1.bf16.msra.mxu0 %v2322_v60  ;;  %v2336_v8 = vsub.f32 %v2152_v46, %v2706_v1  ;;  %v2709_v30 = vand.u32 4294901760, %v2271_v9  ;;  %v370_v1 = vand.u32 4294901760, %v369_v35  ;;  %v2710_v3 = vand.u32 4294901760, %v2046_v55 }
 0x168   :  { %v2341_v54 = vsub.f32 %v2171_v41, %v2707_v2  ;;  %v446_v57 = vsub.f32 %v2251_v25, %v2708_v24  ;;  %1321 = vmatprep.subr.bf16.mxu1 %v1320_v63  ;;  %1429 = vmatprep.subr.bf16.mxu0 %v1428_v29  ;;  %v2711_v52 = vand.u32 4294901760, %v2050_v59  ;;  %v1322_v24 = vpack.c.bf16 %v399_v13, %v387_v48 }
 0x169   :  { %v434_v49 = vsub.f32 %v2271_v9, %v2709_v30  ;;  %v2353_v6 = vsub.f32 %v2046_v55, %v2710_v3  ;;  %v2712_v4 = vand.u32 4294901760, %v2166_v34  ;;  %v2713_v30 = vand.u32 4294901760, %v2161_v14 }
 0x16a   :  { %v2358_v2 = vsub.f32 %v2050_v59, %v2711_v52  ;;  %v2714_v63 = vand.u32 4294901760, %v2140_v45  ;;  %v2715_v29 = vand.u32 4294901760, %v2013_v26  ;;  %v429_v35 = vand.u32 4294901760, %v428_v42 }
 0x16b   :  { %v1430_v37 = vpack.c.bf16 %v2713_v30, %v2712_v4  ;;  %v441_v55 = vand.u32 4294901760, %v440_v10  ;;  %v452_v3 = vsub.f32 %v2284_v20, %v451_v58  ;;  %v464_v60 = vsub.f32 %v2279_v16, %v463_v0 }
 0x16c   :  { %355 = vmatmul.mubr.f32.vlgmr.msra.gmra.mrb[0].mxu1 %v2714_v63  ;;  %902 = vmatmul.mubr.f32.vlgmr.msra.gmra.mrb[0].mxu0 %v2715_v29  ;;  %v2716_v59 = vand.u32 4294901760, %v2298_v31  ;;  %v2717_v48 = vand.u32 4294901760, %v2057_v51  ;;  %v2718_v45 = vand.u32 4294901760, %v2192_v44  ;;  %v2719_v10 = vand.u32 4294901760, %v2314_v22 }
 0x16d   :  { %1323 = vmatpush1.bf16.msra.mxu1 %v1322_v24  ;;  %1431 = vmatpush1.bf16.msra.mxu0 %v1430_v37  ;;  %v2720_v30 = vand.u32 4294901760, %v2086_v17  ;;  %v447_v37 = vand.u32 4294901760, %v446_v57  ;;  %v2721_v24 = vand.u32 4294901760, %v2091_v53  ;;  %v465_v57 = vand.u32 4294901760, %v464_v60 }
 0x16e   :  { %v470_v13 = vsub.f32 %v2298_v31, %v2716_v59  ;;  %v2376_v4 = vsub.f32 %v2057_v51, %v2717_v48  ;;  %v2381_v42 = vsub.f32 %v2192_v44, %v2718_v45  ;;  %v458_v52 = vsub.f32 %v2314_v22, %v2719_v10  ;;  %1325 = vmatprep.subr.bf16.mxu1 %v1811_v23 }
 0x16f   :  { %v2389_v63 = vsub.f32 %v2086_v17, %v2720_v30  ;;  %1433 = vmatprep.subr.bf16.mxu0 %v1798_v7  ;;  %v435_v51 = vand.u32 4294901760, %v434_v49  ;;  %v2396_v29 = vsub.f32 %v2091_v53, %v2721_v24  ;;  %v2722_v59 = vand.u32 4294901760, %v2118_v15  ;;  %365 = vmatprep.mubr.f32.mxu1 %v364_v36 }
 0x170   :  { %v2723_v45 = vand.u32 4294901760, %v2222_v12  ;;  %v499_v10 = vand.u32 4294901760, %v2358_v2  ;;  %v2724_v7 = vand.u32 4294901760, %v2196_v50  ;;  %v1328_v23 = vpack.c.bf16 %v441_v55, %v429_v35  ;;  %371 = vmatmul.mubr.f32.gmra.mrb[2].mxu1 %v370_v1 }
 0x171   :  { %v2401_v48 = vsub.f32 %v2118_v15, %v2722_v59  ;;  %v453_v49 = vand.u32 4294901760, %v452_v3  ;;  %v511_v53 = vand.u32 4294901760, %v2353_v6  ;;  %v2725_v30 = vand.u32 4294901760, %v2199_v5  ;;  %1327 = vmatpush1.bf16.msra.mxu1 %v1818_v27  ;;  %1435 = vmatpush1.bf16.msra.mxu0 %v1802_v11 }
 0x172   :  { %v1436_v17 = vpack.c.bf16 %v2723_v45, %v427_v62  ;;  %910 = vmatprep.mubr.f32.mxu0 %v2724_v7  ;;  %v2629_v15 = vand.u32 4294901760, %v2376_v4  ;;  %v2726_v24 = vand.u32 4294901760, %v2109_v19  ;;  %v477_v36 = vand.u32 4294901760, %v2258_v56  ;;  %1329 = vmatprep.subr.bf16.mxu1 %v1328_v23 }
 0x173   :  { %914 = vmatmul.mubr.f32.gmra.mrb[2].mxu0 %v2725_v30  ;;  %v489_v60 = vand.u32 4294901760, %v2336_v8  ;;  %v505_v1 = vand.u32 4294901760, %v2389_v63  ;;  %v2727_v35 = vand.u32 4294901760, %v2114_v40  ;;  %v1330_v3 = vpack.c.bf16 %v447_v37, %v435_v51  ;;  %622 = vmatprep.mubr.f32.mxu1 %v1857_v47 }
 0x174   :  { %v2415_v62 = vsub.f32 %v2109_v19, %v2726_v24  ;;  %1437 = vmatprep.subr.bf16.mxu0 %v1436_v17  ;;  %v2728_v19 = vand.u32 4294901760, %v2271_v9  ;;  %v2729_v27 = vand.u32 4294901760, %v2251_v25  ;;  %v1440_v11 = vpack.c.bf16 %v463_v0, %v451_v58  ;;  %1093 = vmatprep.mubr.f32.mxu0 %v1857_v47 }
 0x175   :  { %v2425_v55 = vsub.f32 %v2114_v40, %v2727_v35  ;;  %v459_v45 = vand.u32 4294901760, %v458_v52  ;;  %v471_v56 = vand.u32 4294901760, %v470_v13  ;;  %v500_v8 = vsub.f32 %v2358_v2, %v499_v10  ;;  %1331 = vmatpush1.bf16.msra.mxu1 %v1330_v3 }
 0x176   :  { %v1438_v59 = vpack.c.bf16 %v2729_v27, %v2728_v19  ;;  %v1332_v7 = vpack.c.bf16 %v465_v57, %v453_v49  ;;  %v512_v40 = vsub.f32 %v2353_v6, %v511_v53  ;;  %v523_v17 = vand.u32 4294901760, %v2401_v48 }
 0x177   :  { %v535_v51 = vand.u32 4294901760, %v2396_v29  ;;  %v1336_v37 = vpack.c.bf16 %v489_v60, %v477_v36  ;;  %v2730_v0 = vand.u32 4294901760, %v2147_v61  ;;  %v2731_v58 = vand.u32 4294901760, %v2152_v46 }
 0x178   :  { %1439 = vmatpush1.bf16.msra.mxu0 %v1438_v59  ;;  %v483_v52 = vand.u32 4294901760, %v2341_v54  ;;  %v495_v23 = vand.u32 4294901760, %v2381_v42  ;;  %v518_v49 = vsub.f32 %v2376_v4, %v2629_v15  ;;  %v506_v57 = vsub.f32 %v2389_v63, %v505_v1  ;;  %1333 = vmatprep.subr.bf16.mxu1 %v1332_v7 }
 0x179   :  { %v1444_v13 = vpack.c.bf16 %v2731_v58, %v2730_v0  ;;  %v541_v30 = vand.u32 4294901760, %v2415_v62  ;;  %v529_v24 = vand.u32 4294901760, %v2425_v55  ;;  %1441 = vmatprep.subr.bf16.mxu0 %v1440_v11  ;;  %v2732_v36 = vand.u32 4294901760, %v2203_v43 }
 0x17a   :  { %v2733_v54 = vand.u32 4294901760, %v2207_v38  ;;  %v1334_v35 = vpack.c.bf16 %v471_v56, %v459_v45  ;;  %v2734_v3 = vand.u32 4294901760, %v2314_v22  ;;  %v2735_v19 = vand.u32 4294901760, %v2298_v31 }
 0x17b   :  { %v2452_v60 = vsub.f32 %v2203_v43, %v2732_v36  ;;  %v501_v59 = vand.u32 4294901760, %v500_v8  ;;  %v513_v0 = vand.u32 4294901760, %v512_v40  ;;  %v524_v11 = vsub.f32 %v2401_v48, %v523_v17 }
 0x17c   :  { %v2457_v42 = vsub.f32 %v2207_v38, %v2733_v54  ;;  %v1442_v27 = vpack.c.bf16 %v2735_v19, %v2734_v3  ;;  %v536_v7 = vsub.f32 %v2396_v29, %v535_v51  ;;  %v2736_v43 = vand.u32 4294901760, %v2239_v21  ;;  %1335 = vmatpush1.bf16.msra.mxu1 %v1334_v35 }
 0x17d   :  { %v1338_v38 = vpack.c.bf16 %v495_v23, %v483_v52  ;;  %v2737_v45 = vand.u32 4294901760, %v2171_v41  ;;  %v2738_v56 = vand.u32 4294901760, %v2192_v44  ;;  %v542_v8 = vsub.f32 %v2415_v62, %v541_v30  ;;  %1337 = vmatprep.subr.bf16.mxu1 %v1336_v37 }
 0x17e   :  { %v2468_v58 = vsub.f32 %v2239_v21, %v2736_v43  ;;  %1443 = vmatpush1.bf16.msra.mxu0 %v1442_v27  ;;  %v530_v40 = vsub.f32 %v2425_v55, %v529_v24  ;;  %v2739_v54 = vand.u32 4294901760, %v2245_v33  ;;  %v1448_v21 = vpack.c.bf16 %v511_v53, %v499_v10 }
 0x17f   :  { %v1446_v36 = vpack.c.bf16 %v2738_v56, %v2737_v45  ;;  %1445 = vmatprep.subr.bf16.mxu0 %v1444_v13  ;;  %v507_v35 = vand.u32 4294901760, %v506_v57  ;;  %v519_v19 = vand.u32 4294901760, %v518_v49  ;;  %v571_v52 = vand.u32 4294901760, %v2457_v42 }
 0x180   :  { %v2479_v3 = vsub.f32 %v2245_v33, %v2739_v54  ;;  %v1340_v23 = vpack.c.bf16 %v513_v0, %v501_v59  ;;  %v525_v27 = vand.u32 4294901760, %v524_v11  ;;  %v537_v43 = vand.u32 4294901760, %v536_v7  ;;  %1339 = vmatpush1.bf16.msra.mxu1 %v1338_v38 }
 0x181   :  { %v583_v45 = vand.u32 4294901760, %v2452_v60  ;;  %v589_v56 = vand.u32 4294901760, %v2468_v58  ;;  %v1342_v33 = vpack.c.bf16 %v519_v19, %v507_v35  ;;  %v2740_v10 = vand.u32 4294901760, %v2376_v4  ;;  %v2742_v35 = vld [vmem:[#allocation33_spill] sm:$0xff] }
 0x182   :  { %1447 = vmatpush1.bf16.msra.mxu0 %v1446_v36  ;;  %v577_v15 = vand.u32 4294901760, %v2479_v3  ;;  %1341 = vmatprep.subr.bf16.mxu1 %v1340_v23  ;;  %v531_v37 = vand.u32 4294901760, %v530_v40  ;;  %v543_v13 = vand.u32 4294901760, %v542_v8  ;;  %v1344_v49 = vpack.c.bf16 %v537_v43, %v525_v27  ;;  %v2749_v27 = vld [vmem:[#allocation13_spill] sm:$0xff]  ;;  %v2750_v43 = vld [vmem:[#allocation35_spill] sm:$0xff] }
 0x183   :  { %1449 = vmatprep.subr.bf16.mxu0 %v1448_v21  ;;  %v1450_v53 = vpack.c.bf16 %v2740_v10, %v505_v1  ;;  %v1452_v57 = vpack.c.bf16 %v535_v51, %v523_v17  ;;  %v572_v59 = vsub.f32 %v2457_v42, %v571_v52  ;;  %v584_v0 = vsub.f32 %v2452_v60, %v583_v45 }
 0x184   :  { %1343 = vmatpush1.bf16.msra.mxu1 %v1342_v33  ;;  %v590_v11 = vsub.f32 %v2468_v58, %v589_v56  ;;  %v578_v7 = vsub.f32 %v2479_v3, %v577_v15  ;;  %v1346_v38 = vpack.c.bf16 %v543_v13, %v531_v37  ;;  %v1454_v36 = vpack.c.bf16 %v541_v30, %v529_v24  ;;  %v2741_v24 = vld [vmem:[#allocation36_spill] sm:$0xff] }
 0x185   :  { %1345 = vmatprep.subr.bf16.mxu1 %v1344_v49  ;;  %v573_v54 = vand.u32 4294901760, %v572_v59  ;;  %v585_v1 = vand.u32 4294901760, %v584_v0  ;;  %v1460_v40 = vpack.c.bf16 %v583_v45, %v571_v52  ;;  %v1462_v30 = vpack.c.bf16 %v589_v56, %v577_v15  ;;  %v2744_v52 = vld [vmem:[#allocation27_spill] sm:$0xff]  ;;  %v2747_v15 = vld [vmem:[#allocation12_spill] sm:$0xff]  ;;  %v2751_v45 = vld [vmem:[#allocation42_spill] sm:$0xff] }
 0x186   :  { %1451 = vmatpush1.bf16.msra.mxu0 %v1450_v53  ;;  %v579_v17 = vand.u32 4294901760, %v578_v7  ;;  %v591_v51 = vand.u32 4294901760, %v590_v11  ;;  %v1356_v19 = vpack.c.bf16 %v2742_v35, %v2741_v24  ;;  %v2753_v56 = vld [vmem:[#allocation17_spill] sm:$0xff]  ;;  %v2754_v33 = vld [vmem:[#allocation16_spill] sm:$0xff]  ;;  %v2756_v53 = vld [vmem:[#allocation15_spill] sm:$0xff]  ;;  %v1366_v13 = vpack.c.bf16 %v2251_v25, %v2271_v9 }
 0x187   :  { %1453 = vmatprep.subr.bf16.mxu0 %v1452_v57  ;;  %v1352_v8 = vpack.c.bf16 %v585_v1, %v573_v54  ;;  %v2755_v10 = vpack.c.bf16 %v2753_v56, %v2754_v33  ;;  %v2757_v37 = vld [vmem:[#allocation28_spill] sm:$0xff]  ;;  %v2759_v57 = vld [vmem:[#allocation29_spill] sm:$0xff]  ;;  %v2760_v59 = vld [vmem:[#allocation30_spill] sm:$0xff]  ;;  %v1372_v0 = vpack.c.bf16 %v2152_v46, %v2147_v61  ;;  %v1370_v11 = vpack.c.bf16 %v2298_v31, %v2314_v22 }
 0x188   :  { %1347 = vmatpush1.bf16.msra.mxu1 %v1346_v38  ;;  %v1354_v21 = vpack.c.bf16 %v591_v51, %v579_v17  ;;  %v2758_v49 = vld [vmem:[#allocation24_spill] sm:$0xff]  ;;  %v2761_v25 = vld [vmem:[#allocation34_spill] sm:$0xff]  ;;  %v2762_v9 = vld [vmem:[#allocation31_spill] sm:$0xff]  ;;  %v1378_v61 = vpack.c.bf16 %v2376_v4, %v2389_v63  ;;  %v1380_v31 = vpack.c.bf16 %v2396_v29, %v2401_v48  ;;  %v1388_v63 = vpack.c.bf16 %v2452_v60, %v2457_v42 }
 0x189   :  { %1349 = vmatprep.subr.bf16.mxu1 %v1820_v28  ;;  %v2743_v28 = vld [vmem:[#allocation25_spill] sm:$0xff]  ;;  %v2769_v7 = vld [vmem:[#allocation18_spill] sm:$0xff]  ;;  %v2771_v4 = vld [vmem:[#allocation19_spill] sm:$0xff] }
 0x18a   :  { %1455 = vmatpush1.bf16.msra.mxu0 %v1454_v36  ;;  %v2764_v46 = vld [vmem:[#allocation37_spill] sm:$0xff]  ;;  %v2772_v29 = vld [vmem:[#allocation23_spill] sm:$0xff]  ;;  %v2775_v54 = vld [vmem:[#allocation22_spill] sm:$0xff] }
 0x18b   :  { %1457 = vmatprep.subr.bf16.mxu0 %v1808_v18  ;;  %v1358_v18 = vpack.c.bf16 %v2161_v14, %v2166_v34  ;;  %v1364_v14 = vpack.c.bf16 %v2222_v12, %v2751_v45  ;;  %v2752_v34 = vld [vmem:[#allocation38_spill] sm:$0xff]  ;;  %v1368_v12 = vpack.c.bf16 %v2279_v16, %v2284_v20  ;;  %v1376_v16 = vpack.c.bf16 %v2353_v6, %v2358_v2  ;;  %v2763_v20 = vld [vmem:[#allocation32_spill] sm:$0xff]  ;;  %v2767_v22 = vld [vmem:[#allocation41_spill] sm:$0xff] }
 0x18c   :  { %1351 = vmatpush1.bf16.msra.mxu1 %v1838_v39  ;;  %v2746_v39 = vld [vmem:[#allocation14_spill] sm:$0xff]  ;;  %v1382_v6 = vpack.c.bf16 %v2415_v62, %v2425_v55  ;;  %v2768_v2 = vld [vmem:[#allocation20_spill] sm:$0xff]  ;;  %v2773_v48 = vld [vmem:[#allocation21_spill] sm:$0xff]  ;;  %v1390_v55 = vpack.c.bf16 %v2468_v58, %v2479_v3 }
 0x18d   :  { %1353 = vmatprep.subr.bf16.mxu1 %v1352_v8  ;;  %v2748_v23 = vpack.c.bf16 %v2746_v39, %v2747_v15  ;;  %v2770_v38 = vpack.c.bf16 %v2768_v2, %v2769_v7  ;;  %v2774_v36 = vpack.c.bf16 %v2772_v29, %v2773_v48  ;;  %v2776_v62 = vld [vmem:[#allocation43_spill] sm:$0xff]  ;;  %v2777_v1 = vld [vmem:[#allocation44_spill] sm:$0xff] }
 0x18e   :  { %1459 = vmatpush1.bf16.msra.mxu0 %v1830_v32  ;;  %v2745_v32 = vld [vmem:[#allocation26_spill] sm:$0xff] }
 0x18f   :  { %1461 = vmatprep.subr.bf16.mxu0 %v1460_v40 }
 0x190   :  { %1355 = vmatpush1.bf16.msra.mxu1 %v1354_v21 }
 0x191   :  { %1357 = vmatprep.subr.bf16.mxu1 %v1356_v19 }
 0x192   :  { %1463 = vmatpush1.bf16.msra.mxu0 %v1462_v30 }
 0x193   :  { %1465 = vmatprep.subr.bf16.mxu0 %v2743_v28  ;;  %624 = vmatmul.mubr.f32.vlgmr.msra.gmra.mrb[0].mxu1 %v2744_v52 }
 0x194   :  { %1359 = vmatpush1.bf16.msra.mxu1 %v1358_v18  ;;  %630 = vmatprep.mubr.f32.mxu1 %v2750_v43 }
 0x195   :  { %1095 = vmatmul.mubr.f32.vlgmr.msra.gmra.mrb[0].mxu0 %v2744_v52  ;;  %1361 = vmatprep.subr.bf16.mxu1 %v2748_v23 }
 0x196   :  { %1467 = vmatpush1.bf16.msra.mxu0 %v2745_v32  ;;  %1101 = vmatprep.mubr.f32.mxu0 %v2750_v43 }
 0x197   :  { %1469 = vmatprep.subr.bf16.mxu0 %v2749_v27  ;;  %632 = vmatmul.mubr.f32.gmra.mrb[2].mxu1 %v2752_v34 }
 0x198   :  { %1363 = vmatpush1.bf16.msra.mxu1 %v2755_v10  ;;  %776 = vmatprep.mubr.f32.mxu1 %v2758_v49 }
 0x199   :  { %1103 = vmatmul.mubr.f32.gmra.mrb[2].mxu0 %v2752_v34  ;;  %1365 = vmatprep.subr.bf16.mxu1 %v1364_v14 }
 0x19a   :  { %1471 = vmatpush1.bf16.msra.mxu0 %v2756_v53  ;;  %1210 = vmatprep.mubr.f32.mxu0 %v1857_v47  ;;  %v1374_v47 = vpack.c.bf16 %v2192_v44, %v2171_v41  ;;  %v2765_v44 = vld [vmem:[#allocation39_spill] sm:$0xff]  ;;  %v2766_v41 = vld [vmem:[#allocation40_spill] sm:$0xff] }
 0x19b   :  { %1473 = vmatprep.subr.bf16.mxu0 %v2757_v37 }
 0x19c   :  { %1367 = vmatpush1.bf16.msra.mxu1 %v1366_v13 }
 0x19d   :  { %1369 = vmatprep.subr.bf16.mxu1 %v1368_v12 }
 0x19e   :  { %1475 = vmatpush1.bf16.msra.mxu0 %v2759_v57 }
 0x19f   :  { %1477 = vmatprep.subr.bf16.mxu0 %v2760_v59  ;;  %v1533_v59 = vld [vmem:[#allocation5] sm:$0xff] }
 0x1a0   :  { %1371 = vmatpush1.bf16.msra.mxu1 %v1370_v11  ;;  %v1534_v11 = vld [vmem:[#allocation5 + $0x8] sm:$0xff] }
 0x1a1   :  { %1373 = vmatprep.subr.bf16.mxu1 %v1372_v0 }
 0x1a2   :  { %1479 = vmatpush1.bf16.msra.mxu0 %v2761_v25 }
 0x1a3   :  { %1481 = vmatprep.subr.bf16.mxu0 %v2762_v9 }
 0x1a4   :  { %1375 = vmatpush1.bf16.msra.mxu1 %v1374_v47 }
 0x1a5   :  { %1377 = vmatprep.subr.bf16.mxu1 %v1376_v16 }
 0x1a6   :  { %1483 = vmatpush1.bf16.msra.mxu0 %v2763_v20  ;;  %v1535_v20 = vld [vmem:[#allocation5 + $0x10] sm:$0xff] }
 0x1a7   :  { %1485 = vmatprep.subr.bf16.mxu0 %v2764_v46 }
 0x1a8   :  { %1379 = vmatpush1.bf16.msra.mxu1 %v1378_v61  ;;  %v1536_v61 = vld [vmem:[#allocation5 + $0x18] sm:$0xff] }
 0x1a9   :  { %1381 = vmatprep.subr.bf16.mxu1 %v1380_v31 }
 0x1aa   :  { %1487 = vmatpush1.bf16.msra.mxu0 %v2765_v44 }
 0x1ab   :  { %1489 = vmatprep.subr.bf16.mxu0 %v2766_v41 }
 0x1ac   :  { %1383 = vmatpush1.bf16.msra.mxu1 %v1382_v6 }
 0x1ad   :  { %1385 = vmatprep.subr.bf16.mxu1 %v2770_v38 }
 0x1ae   :  { %1491 = vmatpush1.bf16.msra.mxu0 %v2767_v22 }
 0x1af   :  { %1493 = vmatprep.subr.bf16.mxu0 %v2771_v4 }
 0x1b0   :  { %1387 = vmatpush1.bf16.msra.mxu1 %v2774_v36 }
 0x1b1   :  { %1389 = vmatprep.subr.bf16.mxu1 %v1388_v63 }
 0x1b2   :  { %1495 = vmatpush1.bf16.msra.mxu0 %v2775_v54 }
 0x1b3   :  { %1497 = vmatprep.subr.bf16.mxu0 %v2776_v62 }
 0x1b4   :  { %1391 = vmatpush1.bf16.msra.mxu1 %v1390_v55 }
 0x1b6   :  { %1499 = vmatpush1.bf16.msra.mxu0 %v2777_v1 }
 0x1b7   :  { %779 = vmatmul.mubr.f32.vlgmr.msra.gmra.mrb[0].mxu1 %v2013_v26 }
 0x1b8   :  { %786 = vmatprep.mubr.f32.mxu1 %v2196_v50 }
 0x1b9   :  { %1212 = vmatmul.mubr.f32.vlgmr.msra.gmra.mrb[0].mxu0 %v2744_v52 }
 0x1ba   :  { %1218 = vmatprep.mubr.f32.mxu0 %v2750_v43 }
 0x1bb   :  { %789 = vmatmul.mubr.f32.gmra.mrb[2].mxu1 %v2199_v5 }
 0x1bd   :  { %1220 = vmatmul.mubr.f32.gmra.mrb[2].mxu0 %v2752_v34 }
 0x28a   :  { %v780_v60 = vpop.f32.mrb[0].mxu1 }
 0x28b   :  { %v782_v51 = vpop.f32.mrb[1].mxu1 }
 0x28c   :  { %v1213_v42 = vpop.f32.mrb[0].mxu0 }
 0x28d   :  { %v1500_v17 = vadd.f32 %v1213_v42, %v780_v60  ;;  %v1215_v58 = vpop.f32.mrb[1].mxu0 }
 0x28e   :  { %v1501_v3 = vadd.f32 %v1215_v58, %v782_v51  ;;  %v790_v8 = vpop.f32.mrb[2].mxu1 }
 0x28f   :  { %v792_v30 = vpop.f32.mrb[3].mxu1 }
 0x290   :  { %v1221_v40 = vpop.f32.mrb[2].mxu0  ;;  %v1226_v21 = vadd.f32 %v1501_v3, %v1500_v17 }
 0x291   :  { %v1502_v26 = vadd.f32 %v1221_v40, %v790_v8  ;;  %v1223_v24 = vpop.f32.mrb[3].mxu0 }
 0x292   :  { %v1503_v35 = vadd.f32 %v1223_v24, %v792_v30  ;;  %1227 = vadd.xlane.f32.xlu0 %v1226_v21 }
 0x294   :  { %v1229_v50 = vadd.f32 %v1503_v35, %v1502_v26 }
 0x296   :  { %1230 = vadd.xlane.f32.xlu1 %v1229_v50 }
 0x31f   :  { %v1228_v19 = vpop.xlane.xlu0 %1227 }
 0x320   :  { %v1232_v5 = vmul.f32 0.00390625, %v1228_v19 }
 0x322   :  { %v1234_v28 = vsub.f32 %v1500_v17, %v1232_v5  ;;  %v1235_v18 = vsub.f32 %v1501_v3, %v1232_v5 }
 0x323   :  { %v1231_v52 = vpop.xlane.xlu1 %1230 }
 0x324   :  { %v1233_v32 = vmul.f32 0.00390625, %v1231_v52  ;;  %v1238_v39 = vmul.f32 %v1234_v28, %v1234_v28  ;;  %v1239_v15 = vmul.f32 %v1235_v18, %v1235_v18 }
 0x326   :  { %v1236_v23 = vsub.f32 %v1502_v26, %v1233_v32  ;;  %v1237_v27 = vsub.f32 %v1503_v35, %v1233_v32  ;;  %v1242_v43 = vadd.f32 %v1239_v15, %v1238_v39 }
 0x328   :  { %1243 = vadd.xlane.f32.xlu0 %v1242_v43  ;;  %v1240_v45 = vmul.f32 %v1236_v23, %v1236_v23  ;;  %v1241_v14 = vmul.f32 %v1237_v27, %v1237_v27 }
 0x32a   :  { %v1245_v34 = vadd.f32 %v1241_v14, %v1240_v45 }
 0x32c   :  { %1246 = vadd.xlane.f32.xlu0 %v1245_v34 }
 0x3b5   :  { %v1244_v56 = vpop.xlane.xlu0 %1243 }
 0x3b6   :  { %v1248_v33 = vmul.f32 0.00390625, %v1244_v56 }
 0x3b8   :  { %v1250_v10 = vadd.f32 1e-05, %v1248_v33 }
 0x3b9   :  { %v1247_v53 = vpop.xlane.xlu0 %1246 }
 0x3ba   :  { %1529 = vrsqrt.f32 %v1250_v10  ;;  %v1249_v37 = vmul.f32 0.00390625, %v1247_v53 }
 0x3bc   :  { %v1251_v13 = vadd.f32 1e-05, %v1249_v37 }
 0x3be   :  { %1531 = vrsqrt.f32 %v1251_v13 }
 0x3c4   :  { %v1530_v49 = vpop.eup %1529 }
 0x3c5   :  { %v1254_v12 = vmul.f32 %v1530_v49, %v1234_v28  ;;  %v1255_v57 = vmul.f32 %v1530_v49, %v1235_v18 }
 0x3c7   :  { %v1258_v0 = vadd.f32 %v1533_v59, %v1254_v12  ;;  %v1259_v25 = vadd.f32 %v1534_v11, %v1255_v57 }
 0x3c8   :  { %v1532_v47 = vpop.eup %1531 }
 0x3c9   :  { %v1256_v9 = vmul.f32 %v1532_v47, %v1236_v23  ;;  %v1257_v16 = vmul.f32 %v1532_v47, %v1237_v27  ;;  %1262 = vst [vmem:[#allocation8] sm:$0xff] %v1258_v0  ;;  %1263 = vst [vmem:[#allocation8 + $0x8] sm:$0xff] %v1259_v25 }
 0x3cb   :  { %v1260_v46 = vadd.f32 %v1535_v20, %v1256_v9  ;;  %v1261_v31 = vadd.f32 %v1536_v61, %v1257_v16 }
 0x3cd   :  { %1264 = vst [vmem:[#allocation8 + $0x10] sm:$0xff] %v1260_v46  ;;  %1265 = vst [vmem:[#allocation8 + $0x18] sm:$0xff] %v1261_v31 }
 0x3ce   :  { %1614 = shalt.err (!%p1611_p0)
}
 0x3cf   :  { %s1615_s30 = scalar_lea.hbm %s2585_s3, 512 }
 0x3d0   :  { %p1616_p1 = scmp.ne.s32.totalorder %s2585_s3, %s1615_s30  ;;  %p1619_p2 = scmp.lt.u32.totalorder %s1615_s30, %s2585_s3 }
 0x3d2   :  { %p1621_p3 = pnand %p1619_p2, %p1616_p1 }
 0x3d4   :  { %1624 = shalt.err (!%p1621_p3)
}
 0x3d5   :  { %1277 = dma.vmem_to_hbm [thread:$0]  %s1272_s26, 512, %s2585_s3, [#allocation4], %s1632_s22, %s1632_s22, %s1633_s23  }
 0x3d6   :  { %1629 = dma.done.wait [#allocation4], 512  }
 0x3d7   :  { %1630 = vsyncadd [#allocation4], 4294966784 }
 0x3d8   :  { %1281 = vsyncpa [#allocation3], 1 }
 0x3d9   :  { %1282 = vsyncpa [#allocation6], 1 }
 0x3da   :  { %1283 = vsyncpa [#allocation4], 1 }

</bundles_post_ra>
